<compile_context>
chip_gen: v5e
topology: v5e:2x2
jax: 0.10.0
libtpu: 0.0.40
codegen_flags: <defaults>
</compile_context>

<pallas_src>
import math

import numpy as np
import jax
import jax.numpy as jnp
from jax import lax
from jax.experimental import pallas as pl
from jax.experimental.pallas import tpu as pltpu


_EXACT_GATHER_MAX_K = 8              # K at/below this -> exact masked-reduce gather
_MATMUL_DTYPES = (jnp.float32, jnp.bfloat16, jnp.float16)
_ONEHOT_VMEM_CAP = 6 * 1024 * 1024   # in-kernel iota + one-hot temporaries


# ----------------------------------------------------------------------------
# Generation-aware tiling for the last-axis path
# ----------------------------------------------------------------------------
def _vmem_capacity_bytes():
    try:
        return int(pltpu.get_tpu_info().vmem_capacity_bytes)
    except Exception:                 # conservative default: v7x (64 MiB / TC)
        return 64 * 1024 * 1024


def _pick_tiling(m, f, k, itemsize, fixed_bytes):
    """Byte-sized M-tile + scoped-VMEM limit (per perf review: size by bytes)."""
    if _vmem_capacity_bytes() >= 100 * 1024 * 1024:   # v5e / v6e: 128 MiB VMEM
        tile_budget, vmem_limit = 20 * 1024 * 1024, 56 * 1024 * 1024
    else:                                             # v7x: 64 MiB VMEM
        tile_budget, vmem_limit = 12 * 1024 * 1024, 30 * 1024 * 1024
    tile_budget = max(tile_budget - fixed_bytes, 2 * 1024 * 1024)
    # Double-buffered input+output tiles plus in-kernel f32/i32 temporaries.
    per_row = 2 * (f + k) * itemsize + (f + k) * 4
    tm = tile_budget // max(per_row, 1)
    if tm >= m:
        return m, vmem_limit          # full-extent block is always legal
    # Sublane alignment: f32 -> 8 rows, bf16/f16 -> 16, int8 -> 32.
    align = max(8, 32 // max(itemsize, 1))
    tm = max(align, (tm // align) * align)
    # TODO(synk): tile the F axis (reduction grid dim) when even an
    # (align, F) slab exceeds the VMEM budget (very large F).
    return min(tm, m), vmem_limit


# ----------------------------------------------------------------------------
# Path A kernels: selection along the last (lane) axis
# ----------------------------------------------------------------------------
def _make_last_axis_kernel(f, k, dtype, mode):
    if mode == "matmul":
        if dtype == jnp.bfloat16:
            compute_dtype, prec = jnp.bfloat16, lax.Precision.DEFAULT
        else:   # f32 (exact via HIGHEST) and f16 (upcast to f32, then exact)
            compute_dtype, prec = jnp.float32, lax.Precision.HIGHEST

        def kernel(idx_ref, x_ref, o_ref):
            # Indices as a (1, K) lane vector (K cheap scalar reads from
            # SMEM).  Rebuilt every grid step (F*K compares, negligible vs the
            # mem-bound tile load) so there is no cross-step scratch state and
            # the grid axis stays safely "parallel" on megacore parts.
            k_iota = lax.broadcasted_iota(jnp.int32, (1, k), 1)
            idx_vec = jnp.zeros((1, k), jnp.int32)
            for j in range(k):
                idx_vec = jnp.where(k_iota == j, idx_ref[j], idx_vec)
            onehot = (
                lax.broadcasted_iota(jnp.int32, (f, k), 0) == idx_vec
            ).astype(compute_dtype)
            # NOTE: a non-finite value in a NON-selected feature contaminates
            # its row (0 * inf = nan); K <= _EXACT_GATHER_MAX_K uses the exact
            # masked-reduce path below instead.
            o_ref[...] = jnp.dot(
                x_ref[...].astype(compute_dtype),
                onehot,
                preferred_element_type=jnp.float32,
                precision=prec,
            ).astype(o_ref.dtype)

        return kernel

    # Exact gather: one masked lane-reduction per selected feature.  Only one
    # term of each sum is non-zero, so the result is bit-exact for every
    # dtype and Inf/NaN in non-selected features cannot leak in.
    acc_dtype = jnp.float32 if jnp.issubdtype(dtype, jnp.floating) else jnp.int32
    # TODO(synk): float64 (x64 mode) would need a wider accumulator.

    def kernel(idx_ref, x_ref, o_ref):
        x = x_ref[...].astype(acc_dtype)
        tm = x.shape[0]
        f_iota = lax.broadcasted_iota(jnp.int32, (1, f), 1)
        k_iota = lax.broadcasted_iota(jnp.int32, (1, k), 1)
        out = jnp.zeros((tm, k), acc_dtype)
        for j in range(k):
            col = jnp.sum(
                jnp.where(f_iota == idx_ref[j], x, jnp.zeros_like(x)),
                axis=1, keepdims=True)                    # (tm, 1), XLU reduce
            out = jnp.where(k_iota == j, col, out)        # place in lane j
        o_ref[...] = out.astype(o_ref.dtype)

    return kernel


def _select_last_axis(values, indices):
    shape = values.shape
    f = shape[-1]
    k = int(indices.shape[0])
    m = math.prod(shape[:-1]) if len(shape) > 1 else 1
    x2 = values.reshape(m, f)          # free: flattening contiguous leading axes
    dt = values.dtype
    isz = dt.itemsize

    onehot_bytes = f * k * (4 + isz)   # in-kernel iota + one-hot temporaries
    use_matmul = (
        k > _EXACT_GATHER_MAX_K
        and dt in _MATMUL_DTYPES
        and onehot_bytes <= _ONEHOT_VMEM_CAP
    )
    mode = "matmul" if use_matmul else "reduce"
    # TODO(synk): for very large K the non-MXU masked-reduce fallback and the
    # f32 HIGHEST matmul on v5e drift from the HBM roofline; an in-VMEM
    # dynamic lane-gather would keep both mem-bound.

    tm, vmem_limit = _pick_tiling(m, f, k, isz, onehot_bytes if use_matmul else 0)
    grid = (pl.cdiv(m, tm),)

    cost = pl.CostEstimate(
        flops=(2 if use_matmul else 1) * m * f * k,
        transcendentals=0,
        bytes_accessed=m * f * isz + m * k * isz + k * 4,
    )

    out2 = pl.pallas_call(
        _make_last_axis_kernel(f, k, dt, mode),
        out_shape=jax.ShapeDtypeStruct((m, k), dt),
        grid_spec=pltpu.PrefetchScalarGridSpec(
            num_scalar_prefetch=1,                         # indices -> SMEM
            grid=grid,
            in_specs=[pl.BlockSpec((tm, f), lambda i, idx: (i, 0))],
            out_specs=pl.BlockSpec((tm, k), lambda i, idx: (i, 0)),
        ),
        compiler_params=pltpu.CompilerParams(
            dimension_semantics=("parallel",),
            vmem_limit_bytes=vmem_limit,
        ),
        cost_estimate=cost,
    )(indices, x2)
    return out2.reshape(shape[:-1] + (k,))


# ----------------------------------------------------------------------------
# Path B: interior dim — HBM->HBM DMA gather (no VMEM staging block)
# ----------------------------------------------------------------------------
def _make_dma_gather_kernel(k, depth):
    def kernel(idx_ref, x_hbm, o_hbm, sems):
        l = pl.program_id(0)

        def row_copy(j):
            # x[l, indices[j], :] -> out[l, j, :], straight HBM->HBM.
            return pltpu.make_async_copy(
                x_hbm.at[l, idx_ref[j]], o_hbm.at[l, j], sems.at[j % depth])

        # Statically unrolled, windowed pipeline: at most `depth` DMAs in
        # flight (K is small in practice, so full unrolling is fine).
        for j in range(k):
            if j >= depth:
                row_copy(j - depth).wait()
            row_copy(j).start()
        for j in range(max(0, k - depth), k):
            row_copy(j).wait()

    return kernel


def _select_dma_gather(values, indices, dim):
    shape = values.shape
    f = shape[dim]
    k = int(indices.shape[0])
    l = math.prod(shape[:dim]) if dim > 0 else 1
    r = math.prod(shape[dim + 1:])
    x3 = values.reshape(l, f, r)       # free contiguous reshape, no transpose
    isz = values.dtype.itemsize
    depth = max(1, min(k, 8))
    # TODO(synk): for tiny R (a few KiB per row) coalesce each copy over the
    # leading L axis (one strided DMA per selected index) to amortize the
    # per-DMA fixed cost.

    cost = pl.CostEstimate(
        flops=0,
        transcendentals=0,
        bytes_accessed=2 * l * k * r * isz + k * 4,
    )

    out3 = pl.pallas_call(
        _make_dma_gather_kernel(k, depth),
        out_shape=jax.ShapeDtypeStruct((l, k, r), values.dtype),
        grid_spec=pltpu.PrefetchScalarGridSpec(
            num_scalar_prefetch=1,                          # indices -> SMEM
            grid=(l,),
            in_specs=[pl.BlockSpec(memory_space=pl.ANY)],   # stays in HBM
            out_specs=pl.BlockSpec(memory_space=pl.ANY),    # written via DMA
            scratch_shapes=[pltpu.SemaphoreType.DMA((depth,))],
        ),
        compiler_params=pltpu.CompilerParams(
            dimension_semantics=("arbitrary",),
        ),
        cost_estimate=cost,
    )(indices, x3)
    return out3.reshape(shape[:dim] + (k,) + shape[dim + 1:])


# ----------------------------------------------------------------------------
# Dispatcher + module wrapper
# ----------------------------------------------------------------------------
def feature_select(values: jax.Array, indices: jax.Array, dim: int = -1) -> jax.Array:
    """Pallas implementation of torch.Tensor.index_select(dim, indices)."""
    values = jnp.asarray(values)
    indices = jnp.asarray(indices)
    if indices.ndim != 1:
        raise ValueError("indices must be 1-D (matches torch.index_select)")
    if values.ndim == 0:
        raise ValueError("values must have at least one dimension")

    ndim = values.ndim
    d = int(dim) % ndim
    f = values.shape[d]
    k = int(indices.shape[0])
    out_shape = values.shape[:d] + (k,) + values.shape[d + 1:]

    # torch.index_select raises on out-of-range indices; do the same when the
    # indices are concrete.  Traced indices are clamped below so a bad index
    # can never become an out-of-bounds DMA source address.
    try:
        idx_host = np.asarray(indices)
    except Exception:                  # traced under jit
        idx_host = None
    if idx_host is not None and k > 0:
        if f == 0 or idx_host.min() < 0 or idx_host.max() >= f:
            raise IndexError(
                f"index out of range for dimension {d} with size {f}")

    if k == 0 or values.size == 0:     # degenerate: nothing to move
        return jnp.zeros(out_shape, values.dtype)

    indices = jnp.clip(indices.astype(jnp.int32), 0, f - 1)

    r = math.prod(values.shape[d + 1:])
    if d == ndim - 1 or r == 1:
        # Last-axis selection (or all trailing dims are size 1): lane-dense path.
        out = _select_last_axis(values.reshape(values.shape[:d + 1]), indices)
        return out.reshape(out_shape)
    return _select_dma_gather(values, indices, d)


class FeatureSelector:
    """JAX/Pallas port of botorch's FeatureSelector (TensorTransform).

    forward(values) == values.index_select(dim=self.dim, index=self.indices)
    """

    def __init__(self, indices, dim: int = -1):
        self.indices = jnp.asarray(indices, dtype=jnp.int32)
        self.dim = int(dim)

    def __call__(self, values: jax.Array) -> jax.Array:
        return feature_select(values, self.indices, self.dim)

    forward = __call__


if __name__ == "__main__":
    key = jax.random.PRNGKey(0)
    x = jax.random.normal(key, (2, 4, 16, 16), dtype=jnp.float32)

    # 1) Default FeatureSelector usage: small K along the last axis
    #    (exact masked-reduce path).
    indices = jnp.array([3, 0, 7, 11, 5], dtype=jnp.int32)
    selector = FeatureSelector(indices=indices, dim=-1)
    out = jax.block_until_ready(selector(x))
    ref = jnp.take(x, indices, axis=-1)
    assert out.shape == ref.shape == (2, 4, 16, 5), out.shape
    assert out.dtype == x.dtype
    assert bool(jnp.array_equal(out, ref))

    # 2) Interior dim with duplicate indices (HBM->HBM DMA gather path).
    idx1 = jnp.array([2, 2, 0], dtype=jnp.int32)
    out1 = jax.block_until_ready(feature_select(x, idx1, dim=1))
    ref1 = jnp.take(x, idx1, axis=1)
    assert out1.shape == ref1.shape == (2, 3, 16, 16)
    assert bool(jnp.array_equal(out1, ref1))

    # 3) Larger K along the last axis, f32 (one-hot MXU matmul, HIGHEST).
    xb = jax.random.normal(jax.random.PRNGKey(1), (4, 8, 64), dtype=jnp.float32)
    idx2 = jnp.arange(60, -1, -4, dtype=jnp.int32)            # K = 16
    out2 = jax.block_until_ready(feature_select(xb, idx2, dim=-1))
    ref2 = jnp.take(xb, idx2, axis=-1)
    assert bool(jnp.array_equal(out2, ref2))

    # 4) bfloat16, larger K (one-hot MXU matmul at DEFAULT precision).
    xc = xb.astype(jnp.bfloat16)
    idx3 = jnp.arange(2, 50, 4, dtype=jnp.int32)              # K = 12
    out3 = jax.block_until_ready(feature_select(xc, idx3, dim=-1))
    ref3 = jnp.take(xc, idx3, axis=-1)
    assert out3.dtype == jnp.bfloat16
    assert bool(jnp.array_equal(out3, ref3))

    # 5) Integer dtype along the last axis (v1's per-element-DMA hole is
    #    closed: exact masked-reduce path).
    xi = jax.random.randint(jax.random.PRNGKey(2), (3, 5, 32), 0, 100,
                            dtype=jnp.int32)
    idx4 = jnp.array([31, 0, 7], dtype=jnp.int32)
    out4 = jax.block_until_ready(feature_select(xi, idx4, dim=-1))
    ref4 = jnp.take(xi, idx4, axis=-1)
    assert bool(jnp.array_equal(out4, ref4))

    print("KERNEL_OK")
</pallas_src>

<mosaic_0001>
module attributes {stable_mosaic.version = 11 : i64} {
  func.func @kernel(%arg0: i32, %arg1: memref<5xi32, #tpu.memory_space<smem>>, %arg2: memref<128x16xf32, #tpu.memory_space<vmem>>, %arg3: memref<128x5xf32, #tpu.memory_space<vmem>>) attributes {dimension_semantics = [#tpu.dimension_semantics<parallel>], iteration_bounds = array<i64: 1>, scalar_prefetch = 1 : i64, scratch_operands = 0 : i64, tpu.core_type = #tpu.core_type<tc>, window_params = [{transform_indices = @transform_0, window_bounds = array<i64: 128, 16>}, {transform_indices = @transform_1, window_bounds = array<i64: 128, 5>}]} {
    %c0 = arith.constant 0 : index
    %c0_0 = arith.constant 0 : index
    %0 = vector.load %arg2[%c0, %c0_0] : memref<128x16xf32, #tpu.memory_space<vmem>>, vector<128x16xf32>
    %1 = tpu.iota {dimensions = array<i32: 1>} : vector<1x16xi32>
    %2 = tpu.iota {dimensions = array<i32: 1>} : vector<1x5xi32>
    %cst = arith.constant 0.000000e+00 : f32
    %3 = vector.broadcast %cst : f32 to vector<128x5xf32>
    %c0_1 = arith.constant 0 : index
    %4 = memref.load %arg1[%c0_1] : memref<5xi32, #tpu.memory_space<smem>>
    %5 = vector.broadcast %4 : i32 to vector<1x16xi32>
    %6 = arith.cmpi eq, %1, %5 : vector<1x16xi32>
    %cst_2 = arith.constant 0.000000e+00 : f32
    %7 = vector.broadcast %cst_2 : f32 to vector<128x16xf32>
    %8 = vector.shape_cast %6 : vector<1x16xi1> to vector<1x16xi1>
    %9 = vector.broadcast %8 : vector<1x16xi1> to vector<128x16xi1>
    %10 = arith.select %9, %0, %7 : vector<128x16xi1>, vector<128x16xf32>
    %cst_3 = arith.constant dense<0.000000e+00> : vector<128xf32>
    %11 = vector.multi_reduction <add>, %10, %cst_3 [1] : vector<128x16xf32> to vector<128xf32>
    %12 = vector.shape_cast %11 : vector<128xf32> to vector<128x1xf32>
    %c0_i32 = arith.constant 0 : i32
    %13 = vector.broadcast %c0_i32 : i32 to vector<1x5xi32>
    %14 = arith.cmpi eq, %2, %13 : vector<1x5xi32>
    %15 = vector.shape_cast %14 : vector<1x5xi1> to vector<1x5xi1>
    %16 = vector.broadcast %15 : vector<1x5xi1> to vector<128x5xi1>
    %17 = vector.shape_cast %12 : vector<128x1xf32> to vector<128x1xf32>
    %18 = vector.broadcast %17 : vector<128x1xf32> to vector<128x5xf32>
    %19 = arith.select %16, %18, %3 : vector<128x5xi1>, vector<128x5xf32>
    %c1 = arith.constant 1 : index
    %20 = memref.load %arg1[%c1] : memref<5xi32, #tpu.memory_space<smem>>
    %21 = vector.broadcast %20 : i32 to vector<1x16xi32>
    %22 = arith.cmpi eq, %1, %21 : vector<1x16xi32>
    %cst_4 = arith.constant 0.000000e+00 : f32
    %23 = vector.broadcast %cst_4 : f32 to vector<128x16xf32>
    %24 = vector.shape_cast %22 : vector<1x16xi1> to vector<1x16xi1>
    %25 = vector.broadcast %24 : vector<1x16xi1> to vector<128x16xi1>
    %26 = arith.select %25, %0, %23 : vector<128x16xi1>, vector<128x16xf32>
    %cst_5 = arith.constant dense<0.000000e+00> : vector<128xf32>
    %27 = vector.multi_reduction <add>, %26, %cst_5 [1] : vector<128x16xf32> to vector<128xf32>
    %28 = vector.shape_cast %27 : vector<128xf32> to vector<128x1xf32>
    %c1_i32 = arith.constant 1 : i32
    %29 = vector.broadcast %c1_i32 : i32 to vector<1x5xi32>
    %30 = arith.cmpi eq, %2, %29 : vector<1x5xi32>
    %31 = vector.shape_cast %30 : vector<1x5xi1> to vector<1x5xi1>
    %32 = vector.broadcast %31 : vector<1x5xi1> to vector<128x5xi1>
    %33 = vector.shape_cast %28 : vector<128x1xf32> to vector<128x1xf32>
    %34 = vector.broadcast %33 : vector<128x1xf32> to vector<128x5xf32>
    %35 = arith.select %32, %34, %19 : vector<128x5xi1>, vector<128x5xf32>
    %c2 = arith.constant 2 : index
    %36 = memref.load %arg1[%c2] : memref<5xi32, #tpu.memory_space<smem>>
    %37 = vector.broadcast %36 : i32 to vector<1x16xi32>
    %38 = arith.cmpi eq, %1, %37 : vector<1x16xi32>
    %cst_6 = arith.constant 0.000000e+00 : f32
    %39 = vector.broadcast %cst_6 : f32 to vector<128x16xf32>
    %40 = vector.shape_cast %38 : vector<1x16xi1> to vector<1x16xi1>
    %41 = vector.broadcast %40 : vector<1x16xi1> to vector<128x16xi1>
    %42 = arith.select %41, %0, %39 : vector<128x16xi1>, vector<128x16xf32>
    %cst_7 = arith.constant dense<0.000000e+00> : vector<128xf32>
    %43 = vector.multi_reduction <add>, %42, %cst_7 [1] : vector<128x16xf32> to vector<128xf32>
    %44 = vector.shape_cast %43 : vector<128xf32> to vector<128x1xf32>
    %c2_i32 = arith.constant 2 : i32
    %45 = vector.broadcast %c2_i32 : i32 to vector<1x5xi32>
    %46 = arith.cmpi eq, %2, %45 : vector<1x5xi32>
    %47 = vector.shape_cast %46 : vector<1x5xi1> to vector<1x5xi1>
    %48 = vector.broadcast %47 : vector<1x5xi1> to vector<128x5xi1>
    %49 = vector.shape_cast %44 : vector<128x1xf32> to vector<128x1xf32>
    %50 = vector.broadcast %49 : vector<128x1xf32> to vector<128x5xf32>
    %51 = arith.select %48, %50, %35 : vector<128x5xi1>, vector<128x5xf32>
    %c3 = arith.constant 3 : index
    %52 = memref.load %arg1[%c3] : memref<5xi32, #tpu.memory_space<smem>>
    %53 = vector.broadcast %52 : i32 to vector<1x16xi32>
    %54 = arith.cmpi eq, %1, %53 : vector<1x16xi32>
    %cst_8 = arith.constant 0.000000e+00 : f32
    %55 = vector.broadcast %cst_8 : f32 to vector<128x16xf32>
    %56 = vector.shape_cast %54 : vector<1x16xi1> to vector<1x16xi1>
    %57 = vector.broadcast %56 : vector<1x16xi1> to vector<128x16xi1>
    %58 = arith.select %57, %0, %55 : vector<128x16xi1>, vector<128x16xf32>
    %cst_9 = arith.constant dense<0.000000e+00> : vector<128xf32>
    %59 = vector.multi_reduction <add>, %58, %cst_9 [1] : vector<128x16xf32> to vector<128xf32>
    %60 = vector.shape_cast %59 : vector<128xf32> to vector<128x1xf32>
    %c3_i32 = arith.constant 3 : i32
    %61 = vector.broadcast %c3_i32 : i32 to vector<1x5xi32>
    %62 = arith.cmpi eq, %2, %61 : vector<1x5xi32>
    %63 = vector.shape_cast %62 : vector<1x5xi1> to vector<1x5xi1>
    %64 = vector.broadcast %63 : vector<1x5xi1> to vector<128x5xi1>
    %65 = vector.shape_cast %60 : vector<128x1xf32> to vector<128x1xf32>
    %66 = vector.broadcast %65 : vector<128x1xf32> to vector<128x5xf32>
    %67 = arith.select %64, %66, %51 : vector<128x5xi1>, vector<128x5xf32>
    %c4 = arith.constant 4 : index
    %68 = memref.load %arg1[%c4] : memref<5xi32, #tpu.memory_space<smem>>
    %69 = vector.broadcast %68 : i32 to vector<1x16xi32>
    %70 = arith.cmpi eq, %1, %69 : vector<1x16xi32>
    %cst_10 = arith.constant 0.000000e+00 : f32
    %71 = vector.broadcast %cst_10 : f32 to vector<128x16xf32>
    %72 = vector.shape_cast %70 : vector<1x16xi1> to vector<1x16xi1>
    %73 = vector.broadcast %72 : vector<1x16xi1> to vector<128x16xi1>
    %74 = arith.select %73, %0, %71 : vector<128x16xi1>, vector<128x16xf32>
    %cst_11 = arith.constant dense<0.000000e+00> : vector<128xf32>
    %75 = vector.multi_reduction <add>, %74, %cst_11 [1] : vector<128x16xf32> to vector<128xf32>
    %76 = vector.shape_cast %75 : vector<128xf32> to vector<128x1xf32>
    %c4_i32 = arith.constant 4 : i32
    %77 = vector.broadcast %c4_i32 : i32 to vector<1x5xi32>
    %78 = arith.cmpi eq, %2, %77 : vector<1x5xi32>
    %79 = vector.shape_cast %78 : vector<1x5xi1> to vector<1x5xi1>
    %80 = vector.broadcast %79 : vector<1x5xi1> to vector<128x5xi1>
    %81 = vector.shape_cast %76 : vector<128x1xf32> to vector<128x1xf32>
    %82 = vector.broadcast %81 : vector<128x1xf32> to vector<128x5xf32>
    %83 = arith.select %80, %82, %67 : vector<128x5xi1>, vector<128x5xf32>
    %c0_12 = arith.constant 0 : index
    %c0_13 = arith.constant 0 : index
    %84 = vector.load %arg3[%c0_12, %c0_13] : memref<128x5xf32, #tpu.memory_space<vmem>>, vector<128x5xf32>
    tpu.vector_store %arg3[%c0_12, %c0_13], %83 {strides = array<i32>} : memref<128x5xf32, #tpu.memory_space<vmem>>, vector<128x5xf32>,
    return
  }
  func.func @transform_0(%arg0: i32, %arg1: memref<5xi32, #tpu.memory_space<smem>>) -> (i32, i32) {
    %c0_i32 = arith.constant 0 : i32
    %c0_i32_0 = arith.constant 0 : i32
    return %arg0, %c0_i32 : i32, i32
  }
  func.func @transform_1(%arg0: i32, %arg1: memref<5xi32, #tpu.memory_space<smem>>) -> (i32, i32) {
    %c0_i32 = arith.constant 0 : i32
    %c0_i32_0 = arith.constant 0 : i32
    return %arg0, %c0_i32 : i32, i32
  }
}

</mosaic_0001>

<bundles_post_ra>
// kernel: tpu_custom_call.1
= control target key start
LH: loop header
LB: loop body
LE: loop exit
PB: predicated region body
PF: predicated region fallthrough
CT: control target
= control target key end

     0   :  { %s516_s12 = smov [#allocation3]   ;;  %s1305_s0 = inlined_call_operand.vmem [shape: s32[5], index: 0, kind: input, shape index: {}]   ;;  %s1306_s1 = inlined_call_operand.vmem [shape: f32[128,16], index: 1, kind: input, shape index: {}]   ;;  %s1307_s2 = inlined_call_operand.vmem [shape: f32[128,5], index: 2, kind: output, shape index: {}]  }
   0x1   :  { %s8_s11 = sshll.u32 %s1305_s0, 4  ;;  %s9_s11 = int_to_ptr.vmem [resolvable:$true] %s8_s11 }
   0x2   :  { %11 = dma.vmem_to_smem %s9_s11, 16, %s516_s12, [#allocation2] }
   0x3   :  { %514 = dma.done.wait [#allocation2], 16 }
   0x4   :  { %515 = vsyncadd [#allocation2], 4294967280 }
   0x5   :  { %14 = sfence }
   0x6   :  { %v33_v0 = vlaneseq  ;;  %s35_s13 = sld [smem:[#allocation3]]  ;;  %v540_v2 = vld [vmem:[%s1306_s1 + $0x20] sm:$0xff]  ;;  %v545_v3 = vld [vmem:[%s1306_s1 + $0x10] sm:$0xff]  ;;  %vm56_vm0 = vcmask 130048   ;;  %v572_v13 = vld [vmem:[%s1306_s1 + $0x28] sm:$0xff]  ;;  %vm476_vm11 = vcmask 39936  }
   0x7   :  { %v550_v4 = vld [vmem:[%s1306_s1] sm:$0xff]  ;;  %v577_v14 = vld [vmem:[%s1306_s1 + $0x18] sm:$0xff]  ;;  %v582_v15 = vld [vmem:[%s1306_s1 + $0x8] sm:$0xff]  ;;  %s497_s9 = sld [smem:[#allocation3 + $0x1]] }
   0x8   :  { %v535_v1 = vand.u32 127, %v33_v0  ;;  %v599_v22 = vld [vmem:[%s1306_s1 + $0x40] sm:$0xff]  ;;  %v604_v23 = vld [vmem:[%s1306_s1 + $0x38] sm:$0xff]  ;;  %v609_v24 = vld [vmem:[%s1306_s1 + $0x30] sm:$0xff]  ;;  %s499_s0 = sld [smem:[#allocation3 + $0x3]] }
   0x9   :  { %v626_v31 = vld [vmem:[%s1306_s1 + $0x58] sm:$0xff]  ;;  %v631_v32 = vld [vmem:[%s1306_s1 + $0x50] sm:$0xff]  ;;  %v636_v33 = vld [vmem:[%s1306_s1 + $0x48] sm:$0xff]  ;;  %s500_s18 = sld [smem:[#allocation3 + $0x4]] }
   0xa   :  { %v653_v40 = vld [vmem:[%s1306_s1 + $0x70] sm:$0xff]  ;;  %v658_v41 = vld [vmem:[%s1306_s1 + $0x68] sm:$0xff]  ;;  %v663_v42 = vld [vmem:[%s1306_s1 + $0x60] sm:$0xff]  ;;  %vm105_vm5 = vcmp.eq.s32.totalorder %v535_v1, 0  ;;  %vm193_vm6 = vcmp.eq.s32.totalorder %v535_v1, 1  ;;  %vm281_vm8 = vcmp.eq.s32.totalorder %v535_v1, 2 }
   0xb   :  { %v685_v51 = vld [vmem:[%s1306_s1 + $0x78] sm:$0xff]  ;;  %s498_s1 = sld [smem:[#allocation3 + $0x2]]  ;;  %vm369_vm9 = vcmp.eq.s32.totalorder %v535_v1, 3  ;;  %vm457_vm10 = vcmp.eq.s32.totalorder %v535_v1, 4 }
   0xc   :  { %v36_v5 = vstv %s35_s13 }
   0xd   :  { %vm553_vm1 = vcmp.eq.s32.totalorder %v535_v1, %v36_v5  ;;  %v125_v46 = vstv %s497_s9 }
   0xe   :  { %v44_v7 = vsel %vm553_vm1, %v540_v2, 0.0  ;;  %v42_v8 = vsel %vm553_vm1, %v545_v3, 0.0  ;;  %v40_v9 = vsel %vm553_vm1, %v550_v4, 0.0  ;;  %v45_v16 = vsel %vm553_vm1, %v572_v13, 0.0 }
   0xf   :  { %v69_v10 = vsel %vm56_vm0, %v44_v7, 0.0  ;;  %v63_v11 = vsel %vm56_vm0, %v42_v8, 0.0  ;;  %v57_v12 = vsel %vm56_vm0, %v40_v9, 0.0  ;;  %v43_v17 = vsel %vm553_vm1, %v577_v14, 0.0 }
  0x10   :  { %70 = vadd.xlane.f32.xlu2 %v69_v10  ;;  %64 = vadd.xlane.f32.xlu1 %v63_v11  ;;  %v41_v18 = vsel %vm553_vm1, %v582_v15, 0.0  ;;  %v72_v19 = vsel %vm56_vm0, %v45_v16, 0.0  ;;  %v66_v20 = vsel %vm56_vm0, %v43_v17, 0.0  ;;  %v48_v25 = vsel %vm553_vm1, %v599_v22, 0.0 }
  0x11   :  { %58 = vadd.xlane.f32.xlu0 %v57_v12  ;;  %v60_v21 = vsel %vm56_vm0, %v41_v18, 0.0  ;;  %v47_v26 = vsel %vm553_vm1, %v604_v23, 0.0  ;;  %v46_v27 = vsel %vm553_vm1, %v609_v24, 0.0  ;;  %v81_v28 = vsel %vm56_vm0, %v48_v25, 0.0 }
  0x12   :  { %v78_v29 = vsel %vm56_vm0, %v47_v26, 0.0  ;;  %v75_v30 = vsel %vm56_vm0, %v46_v27, 0.0  ;;  %v51_v34 = vsel %vm553_vm1, %v626_v31, 0.0  ;;  %v50_v35 = vsel %vm553_vm1, %v631_v32, 0.0 }
  0x13   :  { %v49_v36 = vsel %vm553_vm1, %v636_v33, 0.0  ;;  %v90_v37 = vsel %vm56_vm0, %v51_v34, 0.0  ;;  %v87_v38 = vsel %vm56_vm0, %v50_v35, 0.0  ;;  %v54_v43 = vsel %vm553_vm1, %v653_v40, 0.0 }
  0x14   :  { %v84_v39 = vsel %vm56_vm0, %v49_v36, 0.0  ;;  %v53_v44 = vsel %vm553_vm1, %v658_v41, 0.0  ;;  %v52_v45 = vsel %vm553_vm1, %v663_v42, 0.0  ;;  %v99_v47 = vsel %vm56_vm0, %v54_v43, 0.0 }
  0x15   :  { %v96_v48 = vsel %vm56_vm0, %v53_v44, 0.0  ;;  %v93_v49 = vsel %vm56_vm0, %v52_v45, 0.0  ;;  %vm678_vm2 = vcmp.eq.s32.totalorder %v535_v1, %v125_v46  ;;  %v55_v54 = vsel %vm553_vm1, %v685_v51, 0.0 }
  0x16   :  { %v130_v52 = vsel %vm678_vm2, %v582_v15, 0.0  ;;  %v129_v53 = vsel %vm678_vm2, %v550_v4, 0.0  ;;  %v102_v57 = vsel %vm56_vm0, %v55_v54, 0.0  ;;  %v133_v58 = vsel %vm678_vm2, %v540_v2, 0.0 }
  0x17   :  { %v148_v55 = vsel %vm56_vm0, %v130_v52, 0.0  ;;  %v145_v56 = vsel %vm56_vm0, %v129_v53, 0.0  ;;  %v132_v59 = vsel %vm678_vm2, %v577_v14, 0.0  ;;  %v131_v60 = vsel %vm678_vm2, %v545_v3, 0.0 }
  0x18   :  { %73 = vadd.xlane.f32.xlu2 %v72_v19  ;;  %67 = vadd.xlane.f32.xlu1 %v66_v20  ;;  %v157_v61 = vsel %vm56_vm0, %v133_v58, 0.0  ;;  %v154_v62 = vsel %vm56_vm0, %v132_v59, 0.0  ;;  %v151_v63 = vsel %vm56_vm0, %v131_v60, 0.0  ;;  %v136_v0 = vsel %vm678_vm2, %v604_v23, 0.0 }
  0x19   :  { %61 = vadd.xlane.f32.xlu0 %v60_v21  ;;  %v135_v5 = vsel %vm678_vm2, %v609_v24, 0.0  ;;  %v134_v6 = vsel %vm678_vm2, %v572_v13, 0.0  ;;  %v166_v7 = vsel %vm56_vm0, %v136_v0, 0.0  ;;  %v139_v10 = vsel %vm678_vm2, %v631_v32, 0.0 }
  0x1a   :  { %v163_v8 = vsel %vm56_vm0, %v135_v5, 0.0  ;;  %v160_v9 = vsel %vm56_vm0, %v134_v6, 0.0  ;;  %v138_v11 = vsel %vm678_vm2, %v636_v33, 0.0  ;;  %v137_v12 = vsel %vm678_vm2, %v599_v22, 0.0 }
  0x1b   :  { %v175_v16 = vsel %vm56_vm0, %v139_v10, 0.0  ;;  %v172_v17 = vsel %vm56_vm0, %v138_v11, 0.0  ;;  %v169_v18 = vsel %vm56_vm0, %v137_v12, 0.0  ;;  %v142_v19 = vsel %vm678_vm2, %v658_v41, 0.0 }
  0x1c   :  { %v141_v20 = vsel %vm678_vm2, %v663_v42, 0.0  ;;  %v140_v21 = vsel %vm678_vm2, %v626_v31, 0.0  ;;  %v213_v25 = vstv %s498_s1  ;;  %v184_v26 = vsel %vm56_vm0, %v142_v19, 0.0 }
  0x1d   :  { %v181_v27 = vsel %vm56_vm0, %v141_v20, 0.0  ;;  %vm748_vm3 = vcmp.eq.s32.totalorder %v535_v1, %v213_v25  ;;  %v144_v34 = vsel %vm678_vm2, %v685_v51, 0.0  ;;  %v143_v35 = vsel %vm678_vm2, %v653_v40, 0.0 }
  0x1e   :  { %v219_v43 = vsel %vm748_vm3, %v545_v3, 0.0  ;;  %v218_v44 = vsel %vm748_vm3, %v582_v15, 0.0  ;;  %v221_v50 = vsel %vm748_vm3, %v540_v2, 0.0  ;;  %v230_v11 = vsel %vm748_vm3, %v658_v41, 0.0 }
  0x1f   :  { %v239_v46 = vsel %vm56_vm0, %v219_v43, 0.0  ;;  %v245_v54 = vsel %vm56_vm0, %v221_v50, 0.0  ;;  %v272_v19 = vsel %vm56_vm0, %v230_v11, 0.0 }
  0x20   :  { %82 = vadd.xlane.f32.xlu2 %v81_v28  ;;  %79 = vadd.xlane.f32.xlu1 %v78_v29  ;;  %v178_v28 = vsel %vm56_vm0, %v140_v21, 0.0 }
  0x21   :  { %76 = vadd.xlane.f32.xlu0 %v75_v30  ;;  %v217_v30 = vsel %vm748_vm3, %v550_v4, 0.0 }
  0x22   :  { %v233_v36 = vsel %vm56_vm0, %v217_v30, 0.0 }
  0x28   :  { %91 = vadd.xlane.f32.xlu2 %v90_v37  ;;  %88 = vadd.xlane.f32.xlu1 %v87_v38  ;;  %v190_v37 = vsel %vm56_vm0, %v144_v34, 0.0  ;;  %v187_v38 = vsel %vm56_vm0, %v143_v35, 0.0 }
  0x29   :  { %85 = vadd.xlane.f32.xlu0 %v84_v39  ;;  %v220_v39 = vsel %vm748_vm3, %v577_v14, 0.0 }
  0x2a   :  { %v242_v45 = vsel %vm56_vm0, %v220_v39, 0.0 }
  0x30   :  { %100 = vadd.xlane.f32.xlu2 %v99_v47  ;;  %97 = vadd.xlane.f32.xlu1 %v96_v48  ;;  %v236_v47 = vsel %vm56_vm0, %v218_v44, 0.0  ;;  %v223_v48 = vsel %vm748_vm3, %v609_v24, 0.0 }
  0x31   :  { %94 = vadd.xlane.f32.xlu0 %v93_v49  ;;  %v222_v49 = vsel %vm748_vm3, %v572_v13, 0.0  ;;  %v251_v52 = vsel %vm56_vm0, %v223_v48, 0.0 }
  0x32   :  { %v248_v53 = vsel %vm56_vm0, %v222_v49, 0.0 }
  0x38   :  { %149 = vadd.xlane.f32.xlu2 %v148_v55  ;;  %146 = vadd.xlane.f32.xlu1 %v145_v56  ;;  %v226_v55 = vsel %vm748_vm3, %v636_v33, 0.0  ;;  %v225_v56 = vsel %vm748_vm3, %v599_v22, 0.0 }
  0x39   :  { %103 = vadd.xlane.f32.xlu0 %v102_v57  ;;  %v224_v57 = vsel %vm748_vm3, %v604_v23, 0.0  ;;  %v260_v58 = vsel %vm56_vm0, %v226_v55, 0.0  ;;  %v257_v59 = vsel %vm56_vm0, %v225_v56, 0.0 }
  0x3a   :  { %v254_v60 = vsel %vm56_vm0, %v224_v57, 0.0 }
  0x40   :  { %158 = vadd.xlane.f32.xlu2 %v157_v61  ;;  %155 = vadd.xlane.f32.xlu1 %v154_v62  ;;  %v229_v61 = vsel %vm748_vm3, %v663_v42, 0.0  ;;  %v228_v62 = vsel %vm748_vm3, %v626_v31, 0.0 }
  0x41   :  { %152 = vadd.xlane.f32.xlu0 %v151_v63  ;;  %v227_v63 = vsel %vm748_vm3, %v631_v32, 0.0  ;;  %v269_v0 = vsel %vm56_vm0, %v229_v61, 0.0  ;;  %v266_v5 = vsel %vm56_vm0, %v228_v62, 0.0 }
  0x42   :  { %v263_v6 = vsel %vm56_vm0, %v227_v63, 0.0 }
  0x48   :  { %167 = vadd.xlane.f32.xlu2 %v166_v7  ;;  %164 = vadd.xlane.f32.xlu1 %v163_v8  ;;  %v232_v7 = vsel %vm748_vm3, %v685_v51, 0.0  ;;  %v231_v8 = vsel %vm748_vm3, %v653_v40, 0.0 }
  0x49   :  { %161 = vadd.xlane.f32.xlu0 %v160_v9 }
  0x50   :  { %176 = vadd.xlane.f32.xlu2 %v175_v16  ;;  %173 = vadd.xlane.f32.xlu1 %v172_v17  ;;  %v301_v16 = vstv %s499_s0  ;;  %v278_v17 = vsel %vm56_vm0, %v232_v7, 0.0 }
  0x51   :  { %170 = vadd.xlane.f32.xlu0 %v169_v18  ;;  %v275_v18 = vsel %vm56_vm0, %v231_v8, 0.0  ;;  %vm829_vm4 = vcmp.eq.s32.totalorder %v535_v1, %v301_v16 }
  0x52   :  { %v307_v21 = vsel %vm829_vm4, %v545_v3, 0.0  ;;  %v306_v25 = vsel %vm829_vm4, %v582_v15, 0.0  ;;  %v308_v43 = vsel %vm829_vm4, %v577_v14, 0.0  ;;  %v313_v48 = vsel %vm829_vm4, %v599_v22, 0.0 }
  0x53   :  { %v327_v30 = vsel %vm56_vm0, %v307_v21, 0.0  ;;  %v324_v34 = vsel %vm56_vm0, %v306_v25, 0.0  ;;  %v312_v49 = vsel %vm829_vm4, %v604_v23, 0.0  ;;  %v345_v55 = vsel %vm56_vm0, %v313_v48, 0.0 }
  0x54   :  { %v342_v56 = vsel %vm56_vm0, %v312_v49, 0.0  ;;  %v314_v62 = vsel %vm829_vm4, %v636_v33, 0.0  ;;  %v319_v7 = vsel %vm829_vm4, %v653_v40, 0.0  ;;  %v318_v8 = vsel %vm829_vm4, %v658_v41, 0.0 }
  0x55   :  { %v320_v48 = vsel %vm829_vm4, %v685_v51, 0.0 }
  0x58   :  { %185 = vadd.xlane.f32.xlu2 %v184_v26  ;;  %182 = vadd.xlane.f32.xlu1 %v181_v27 }
  0x59   :  { %179 = vadd.xlane.f32.xlu0 %v178_v28  ;;  %v305_v28 = vsel %vm829_vm4, %v550_v4, 0.0 }
  0x5a   :  { %v321_v35 = vsel %vm56_vm0, %v305_v28, 0.0 }
  0x60   :  { %234 = vadd.xlane.f32.xlu2 %v233_v36  ;;  %191 = vadd.xlane.f32.xlu1 %v190_v37  ;;  %v310_v36 = vsel %vm829_vm4, %v572_v13, 0.0  ;;  %v309_v37 = vsel %vm829_vm4, %v540_v2, 0.0 }
  0x61   :  { %188 = vadd.xlane.f32.xlu0 %v187_v38 }
  0x68   :  { %243 = vadd.xlane.f32.xlu2 %v242_v45  ;;  %240 = vadd.xlane.f32.xlu1 %v239_v46  ;;  %v336_v45 = vsel %vm56_vm0, %v310_v36, 0.0  ;;  %v333_v46 = vsel %vm56_vm0, %v309_v37, 0.0 }
  0x69   :  { %237 = vadd.xlane.f32.xlu0 %v236_v47  ;;  %v330_v47 = vsel %vm56_vm0, %v308_v43, 0.0 }
  0x70   :  { %252 = vadd.xlane.f32.xlu2 %v251_v52  ;;  %249 = vadd.xlane.f32.xlu1 %v248_v53  ;;  %v311_v53 = vsel %vm829_vm4, %v609_v24, 0.0 }
  0x71   :  { %246 = vadd.xlane.f32.xlu0 %v245_v54  ;;  %v339_v57 = vsel %vm56_vm0, %v311_v53, 0.0 }
  0x78   :  { %261 = vadd.xlane.f32.xlu2 %v260_v58  ;;  %258 = vadd.xlane.f32.xlu1 %v257_v59  ;;  %v316_v58 = vsel %vm829_vm4, %v626_v31, 0.0  ;;  %v315_v59 = vsel %vm829_vm4, %v631_v32, 0.0 }
  0x79   :  { %255 = vadd.xlane.f32.xlu0 %v254_v60 }
  0x80   :  { %270 = vadd.xlane.f32.xlu2 %v269_v0  ;;  %267 = vadd.xlane.f32.xlu1 %v266_v5  ;;  %v354_v0 = vsel %vm56_vm0, %v316_v58, 0.0  ;;  %v351_v5 = vsel %vm56_vm0, %v315_v59, 0.0 }
  0x81   :  { %264 = vadd.xlane.f32.xlu0 %v263_v6  ;;  %v348_v6 = vsel %vm56_vm0, %v314_v62, 0.0 }
  0x83   :  { %v818_v9 = vpop.xlane.xlu2 %70  ;;  %v820_v10 = vpop.xlane.xlu1 %64 }
  0x84   :  { %v59_v12 = vpop.xlane.xlu0 %58  ;;  %v112_v43 = vsel %vm105_vm5, %v818_v9, 0.0 }
  0x85   :  { %v108_v11 = vsel %vm105_vm5, %v59_v12, 0.0  ;;  %v389_v12 = vstv %s500_s18 }
  0x86   :  { %vm932_vm7 = vcmp.eq.s32.totalorder %v535_v1, %v389_v12 }
  0x87   :  { %v394_v36 = vsel %vm932_vm7, %v582_v15, 0.0  ;;  %v393_v37 = vsel %vm932_vm7, %v550_v4, 0.0  ;;  %v110_v15 = vsel %vm105_vm5, %v820_v10, 0.0  ;;  %v397_v10 = vsel %vm932_vm7, %v540_v2, 0.0 }
  0x88   :  { %279 = vadd.xlane.f32.xlu2 %v278_v17  ;;  %276 = vadd.xlane.f32.xlu1 %v275_v18  ;;  %v412_v20 = vsel %vm56_vm0, %v394_v36, 0.0  ;;  %v409_v53 = vsel %vm56_vm0, %v393_v37, 0.0 }
  0x89   :  { %273 = vadd.xlane.f32.xlu0 %v272_v19  ;;  %v317_v19 = vsel %vm829_vm4, %v663_v42, 0.0 }
  0x8b   :  { %v839_v26 = vpop.xlane.xlu2 %73  ;;  %v841_v27 = vpop.xlane.xlu1 %67 }
  0x8c   :  { %v62_v29 = vpop.xlane.xlu0 %61  ;;  %v113_v2 = vsel %vm105_vm5, %v839_v26, 0.0  ;;  %v400_v26 = vsel %vm932_vm7, %v604_v23, 0.0 }
  0x8d   :  { %v109_v16 = vsel %vm105_vm5, %v62_v29, 0.0  ;;  %v360_v29 = vsel %vm56_vm0, %v318_v8, 0.0  ;;  %v399_v8 = vsel %vm932_vm7, %v609_v24, 0.0 }
  0x90   :  { %328 = vadd.xlane.f32.xlu2 %v327_v30  ;;  %325 = vadd.xlane.f32.xlu1 %v324_v34  ;;  %v363_v30 = vsel %vm56_vm0, %v319_v7, 0.0  ;;  %v357_v34 = vsel %vm56_vm0, %v317_v19, 0.0  ;;  %v398_v19 = vsel %vm932_vm7, %v572_v13, 0.0  ;;  %v427_v13 = vsel %vm56_vm0, %v399_v8, 0.0 }
  0x91   :  { %322 = vadd.xlane.f32.xlu0 %v321_v35 }
  0x93   :  { %v855_v38 = vpop.xlane.xlu2 %82  ;;  %v857_v39 = vpop.xlane.xlu1 %79 }
  0x94   :  { %v862_v44 = vpop.xlane.xlu0 %76  ;;  %v116_v23 = vsel %vm105_vm5, %v855_v38, 0.0  ;;  %v403_v38 = vsel %vm932_vm7, %v631_v32, 0.0 }
  0x95   :  { %v114_v58 = vsel %vm105_vm5, %v862_v44, 0.0 }
  0x98   :  { %337 = vadd.xlane.f32.xlu2 %v336_v45  ;;  %334 = vadd.xlane.f32.xlu1 %v333_v46  ;;  %v111_v45 = vsel %vm105_vm5, %v841_v27, 0.0 }
  0x99   :  { %331 = vadd.xlane.f32.xlu0 %v330_v47 }
  0x9b   :  { %v873_v50 = vpop.xlane.xlu2 %91  ;;  %v875_v52 = vpop.xlane.xlu1 %88 }
  0x9c   :  { %v880_v54 = vpop.xlane.xlu0 %85  ;;  %v119_v32 = vsel %vm105_vm5, %v873_v50, 0.0  ;;  %v406_v50 = vsel %vm932_vm7, %v658_v41, 0.0 }
  0xa0   :  { %346 = vadd.xlane.f32.xlu2 %v345_v55  ;;  %343 = vadd.xlane.f32.xlu1 %v342_v56  ;;  %v366_v55 = vsel %vm56_vm0, %v320_v48, 0.0  ;;  %v396_v56 = vsel %vm932_vm7, %v577_v14, 0.0  ;;  %v439_v48 = vsel %vm56_vm0, %v403_v38, 0.0 }
  0xa1   :  { %340 = vadd.xlane.f32.xlu0 %v339_v57  ;;  %v115_v57 = vsel %vm105_vm5, %v857_v39, 0.0 }
  0xa3   :  { %v891_v60 = vpop.xlane.xlu2 %100  ;;  %v893_v61 = vpop.xlane.xlu1 %97 }
  0xa4   :  { %v898_v63 = vpop.xlane.xlu0 %94  ;;  %v121_v36 = vsel %vm105_vm5, %v893_v61, 0.0 }
  0xa5   :  { %v120_v37 = vsel %vm105_vm5, %v898_v63, 0.0 }
  0xa8   :  { %355 = vadd.xlane.f32.xlu2 %v354_v0  ;;  %352 = vadd.xlane.f32.xlu1 %v351_v5  ;;  %v395_v0 = vsel %vm932_vm7, %v545_v3, 0.0  ;;  %v418_v3 = vsel %vm56_vm0, %v396_v56, 0.0  ;;  %v122_v56 = vsel %vm105_vm5, %v891_v60, 0.0  ;;  %v408_v60 = vsel %vm932_vm7, %v685_v51, 0.0 }
  0xa9   :  { %349 = vadd.xlane.f32.xlu0 %v348_v6  ;;  %v421_v6 = vsel %vm56_vm0, %v397_v10, 0.0  ;;  %v415_v7 = vsel %vm56_vm0, %v395_v0, 0.0  ;;  %v404_v10 = vsel %vm932_vm7, %v626_v31, 0.0  ;;  %v407_v0 = vsel %vm932_vm7, %v653_v40, 0.0 }
  0xab   :  { %v150_v17 = vpop.xlane.xlu2 %149  ;;  %v147_v18 = vpop.xlane.xlu1 %146 }
  0xac   :  { %v920_v21 = vsel %vm193_vm6, %v150_v17, %v109_v16  ;;  %v924_v25 = vsel %vm193_vm6, %v147_v18, %v108_v11  ;;  %v926_v28 = vpop.xlane.xlu0 %103  ;;  %v118_v11 = vsel %vm105_vm5, %v875_v52, 0.0  ;;  %v117_v16 = vsel %vm105_vm5, %v880_v54, 0.0 }
  0xb0   :  { %364 = vadd.xlane.f32.xlu2 %v363_v30  ;;  %361 = vadd.xlane.f32.xlu1 %v360_v29  ;;  %v430_v30 = vsel %vm56_vm0, %v400_v26, 0.0  ;;  %v424_v29 = vsel %vm56_vm0, %v398_v19, 0.0 }
  0xb1   :  { %358 = vadd.xlane.f32.xlu0 %v357_v34  ;;  %v402_v34 = vsel %vm932_vm7, %v636_v33, 0.0 }
  0xb3   :  { %v159_v46 = vpop.xlane.xlu2 %158  ;;  %v156_v47 = vpop.xlane.xlu1 %155 }
  0xb4   :  { %v956_v4 = vsel %vm193_vm6, %v159_v46, %v112_v43  ;;  %v960_v9 = vsel %vm193_vm6, %v156_v47, %v111_v45  ;;  %v153_v49 = vpop.xlane.xlu0 %152  ;;  %v401_v46 = vsel %vm932_vm7, %v599_v22, 0.0 }
  0xb5   :  { %v964_v27 = vsel %vm193_vm6, %v153_v49, %v110_v15  ;;  %v436_v15 = vsel %vm56_vm0, %v402_v34, 0.0  ;;  %v433_v22 = vsel %vm56_vm0, %v401_v46, 0.0  ;;  %v405_v49 = vsel %vm932_vm7, %v663_v42, 0.0 }
  0xb6   :  { %v445_v31 = vsel %vm56_vm0, %v405_v49, 0.0 }
  0xb8   :  { %413 = vadd.xlane.f32.xlu2 %v412_v20  ;;  %410 = vadd.xlane.f32.xlu1 %v409_v53  ;;  %v123_v20 = vsel %vm105_vm5, %v926_v28, 0.0 }
  0xb9   :  { %367 = vadd.xlane.f32.xlu0 %v366_v55 }
  0xbb   :  { %v168_v59 = vpop.xlane.xlu2 %167  ;;  %v165_v62 = vpop.xlane.xlu1 %164 }
  0xbc   :  { %v989_v14 = vsel %vm193_vm6, %v168_v59, %v115_v57  ;;  %v993_v39 = vsel %vm193_vm6, %v165_v62, %v114_v58  ;;  %v162_v5 = vpop.xlane.xlu0 %161  ;;  %v448_v58 = vsel %vm56_vm0, %v406_v50, 0.0  ;;  %v442_v59 = vsel %vm56_vm0, %v404_v10, 0.0 }
  0xbd   :  { %v997_v44 = vsel %vm193_vm6, %v162_v5, %v113_v2 }
  0xc0   :  { %422 = vadd.xlane.f32.xlu2 %v421_v6  ;;  %419 = vadd.xlane.f32.xlu1 %v418_v3  ;;  %v454_v3 = vsel %vm56_vm0, %v408_v60, 0.0 }
  0xc1   :  { %416 = vadd.xlane.f32.xlu0 %v415_v7  ;;  %v451_v7 = vsel %vm56_vm0, %v407_v0, 0.0 }
  0xc3   :  { %v177_v17 = vpop.xlane.xlu2 %176  ;;  %v174_v18 = vpop.xlane.xlu1 %173 }
  0xc4   :  { %v1022_v24 = vsel %vm193_vm6, %v177_v17, %v118_v11  ;;  %v1026_v52 = vsel %vm193_vm6, %v174_v18, %v117_v16  ;;  %v171_v12 = vpop.xlane.xlu0 %170 }
  0xc5   :  { %v1030_v54 = vsel %vm193_vm6, %v171_v12, %v116_v23 }
  0xc8   :  { %431 = vadd.xlane.f32.xlu2 %v430_v30  ;;  %428 = vadd.xlane.f32.xlu1 %v427_v13 }
  0xc9   :  { %425 = vadd.xlane.f32.xlu0 %v424_v29 }
  0xcb   :  { %v186_v43 = vpop.xlane.xlu2 %185  ;;  %v183_v45 = vpop.xlane.xlu1 %182 }
  0xcc   :  { %v1055_v33 = vsel %vm193_vm6, %v186_v43, %v121_v36  ;;  %v208_v61 = vsel %vm193_vm6, %v183_v45, %v120_v37  ;;  %v180_v47 = vpop.xlane.xlu0 %179 }
  0xcd   :  { %v207_v63 = vsel %vm193_vm6, %v180_v47, %v119_v32 }
  0xd0   :  { %440 = vadd.xlane.f32.xlu2 %v439_v48  ;;  %437 = vadd.xlane.f32.xlu1 %v436_v15 }
  0xd1   :  { %434 = vadd.xlane.f32.xlu0 %v433_v22 }
  0xd3   :  { %v235_v53 = vpop.xlane.xlu2 %234  ;;  %v192_v55 = vpop.xlane.xlu1 %191 }
  0xd4   :  { %v1083_v41 = vsel %vm281_vm8, %v235_v53, %v924_v25  ;;  %v211_v42 = vsel %vm193_vm6, %v192_v55, %v123_v20  ;;  %v189_v57 = vpop.xlane.xlu0 %188 }
  0xd5   :  { %v210_v28 = vsel %vm193_vm6, %v189_v57, %v122_v56 }
  0xd8   :  { %449 = vadd.xlane.f32.xlu2 %v448_v58  ;;  %446 = vadd.xlane.f32.xlu1 %v445_v31 }
  0xd9   :  { %443 = vadd.xlane.f32.xlu0 %v442_v59 }
  0xdb   :  { %v244_v25 = vpop.xlane.xlu2 %243  ;;  %v241_v62 = vpop.xlane.xlu1 %240 }
  0xdc   :  { %v287_v2 = vsel %vm281_vm8, %v244_v25, %v960_v9  ;;  %v1104_v5 = vsel %vm281_vm8, %v241_v62, %v964_v27  ;;  %v238_v6 = vpop.xlane.xlu0 %237 }
  0xdd   :  { %v285_v51 = vsel %vm281_vm8, %v238_v6, %v920_v21 }
  0xe0   :  { %455 = vadd.xlane.f32.xlu1 %v454_v3 }
  0xe1   :  { %452 = vadd.xlane.f32.xlu0 %v451_v7 }
  0xe3   :  { %v253_v40 = vpop.xlane.xlu2 %252  ;;  %v250_v35 = vpop.xlane.xlu1 %249 }
  0xe4   :  { %v1114_v9 = vsel %vm281_vm8, %v253_v40, %v993_v39  ;;  %v1119_v27 = vsel %vm281_vm8, %v250_v35, %v997_v44  ;;  %v247_v26 = vpop.xlane.xlu0 %246 }
  0xe5   :  { %v288_v21 = vsel %vm281_vm8, %v247_v26, %v956_v4 }
  0xeb   :  { %v262_v8 = vpop.xlane.xlu2 %261  ;;  %v259_v11 = vpop.xlane.xlu1 %258 }
  0xec   :  { %v1127_v16 = vsel %vm281_vm8, %v262_v8, %v1026_v52  ;;  %v1132_v39 = vsel %vm281_vm8, %v259_v11, %v1030_v54  ;;  %v256_v17 = vpop.xlane.xlu0 %255 }
  0xed   :  { %v291_v44 = vsel %vm281_vm8, %v256_v17, %v989_v14 }
  0xf3   :  { %v271_v18 = vpop.xlane.xlu2 %270  ;;  %v268_v19 = vpop.xlane.xlu1 %267 }
  0xf4   :  { %v1139_v4 = vsel %vm281_vm8, %v271_v18, %v208_v61  ;;  %v1143_v23 = vsel %vm281_vm8, %v268_v19, %v207_v63  ;;  %v265_v52 = vpop.xlane.xlu0 %264 }
  0xf5   :  { %v294_v12 = vsel %vm281_vm8, %v265_v52, %v1022_v24 }
  0xfb   :  { %v280_v54 = vpop.xlane.xlu2 %279  ;;  %v277_v30 = vpop.xlane.xlu1 %276 }
  0xfc   :  { %v1150_v14 = vsel %vm281_vm8, %v280_v54, %v211_v42  ;;  %v1154_v13 = vsel %vm281_vm8, %v277_v30, %v210_v28  ;;  %v274_v29 = vpop.xlane.xlu0 %273 }
  0xfd   :  { %v1159_v38 = vsel %vm281_vm8, %v274_v29, %v1055_v33 }
 0x103   :  { %v329_v34 = vpop.xlane.xlu2 %328  ;;  %v326_v36 = vpop.xlane.xlu1 %325 }
 0x104   :  { %v323_v37 = vpop.xlane.xlu0 %322  ;;  %v373_v33 = vsel %vm369_vm9, %v326_v36, %v285_v51  ;;  %v374_v58 = vsel %vm369_vm9, %v329_v34, %v1104_v5 }
 0x105   :  { %v372_v49 = vsel %vm369_vm9, %v323_v37, %v1083_v41 }
 0x10b   :  { %v338_v24 = vpop.xlane.xlu2 %337  ;;  %v335_v43 = vpop.xlane.xlu1 %334 }
 0x10c   :  { %v332_v45 = vpop.xlane.xlu0 %331  ;;  %v376_v41 = vsel %vm369_vm9, %v335_v43, %v288_v21  ;;  %v377_v6 = vsel %vm369_vm9, %v338_v24, %v1119_v27 }
 0x10d   :  { %v375_v42 = vsel %vm369_vm9, %v332_v45, %v287_v2 }
 0x113   :  { %v347_v46 = vpop.xlane.xlu2 %346  ;;  %v344_v32 = vpop.xlane.xlu1 %343 }
 0x114   :  { %v341_v61 = vpop.xlane.xlu0 %340  ;;  %v379_v62 = vsel %vm369_vm9, %v344_v32, %v291_v44  ;;  %v380_v21 = vsel %vm369_vm9, %v347_v46, %v1132_v39 }
 0x115   :  { %v378_v0 = vsel %vm369_vm9, %v341_v61, %v1114_v9 }
 0x11b   :  { %v356_v47 = vpop.xlane.xlu2 %355  ;;  %v353_v63 = vpop.xlane.xlu1 %352 }
 0x11c   :  { %v350_v48 = vpop.xlane.xlu0 %349  ;;  %v382_v35 = vsel %vm369_vm9, %v353_v63, %v294_v12  ;;  %v383_v52 = vsel %vm369_vm9, %v356_v47, %v1143_v23 }
 0x11d   :  { %v381_v9 = vsel %vm369_vm9, %v350_v48, %v1127_v16 }
 0x123   :  { %v1161_v15 = vpop.xlane.xlu2 %364  ;;  %v362_v22 = vpop.xlane.xlu1 %361 }
 0x124   :  { %v359_v50 = vpop.xlane.xlu0 %358  ;;  %v385_v39 = vsel %vm369_vm9, %v362_v22, %v1159_v38  ;;  %v386_v38 = vsel %vm369_vm9, %v1161_v15, %v1154_v13 }
 0x125   :  { %v384_v44 = vsel %vm369_vm9, %v359_v50, %v1139_v4 }
 0x12b   :  { %v414_v20 = vpop.xlane.xlu2 %413  ;;  %v411_v53 = vpop.xlane.xlu1 %410 }
 0x12c   :  { %v461_v55 = vsel %vm457_vm10, %v414_v20, %v373_v33  ;;  %v460_v10 = vsel %vm457_vm10, %v411_v53, %v372_v49  ;;  %v368_v56 = vpop.xlane.xlu0 %367 }
 0x12d   :  { %478 = vst.msk [vmem:[%s1307_s2 + $0x8] sm:$0xff] %vm476_vm11, %v461_v55  ;;  %v387_v23 = vsel %vm369_vm9, %v368_v56, %v1150_v14 }
 0x12e   :  { %477 = vst.msk [vmem:[%s1307_s2] sm:$0xff] %vm476_vm11, %v460_v10 }
 0x133   :  { %v423_v57 = vpop.xlane.xlu2 %422  ;;  %v420_v28 = vpop.xlane.xlu1 %419 }
 0x134   :  { %v464_v31 = vsel %vm457_vm10, %v423_v57, %v376_v41  ;;  %v463_v59 = vsel %vm457_vm10, %v420_v28, %v375_v42  ;;  %v417_v60 = vpop.xlane.xlu0 %416 }
 0x135   :  { %481 = vst.msk [vmem:[%s1307_s2 + $0x20] sm:$0xff] %vm476_vm11, %v464_v31  ;;  %v462_v25 = vsel %vm457_vm10, %v417_v60, %v374_v58 }
 0x136   :  { %480 = vst.msk [vmem:[%s1307_s2 + $0x18] sm:$0xff] %vm476_vm11, %v463_v59 }
 0x137   :  { %479 = vst.msk [vmem:[%s1307_s2 + $0x10] sm:$0xff] %vm476_vm11, %v462_v25 }
 0x13b   :  { %v432_v2 = vpop.xlane.xlu2 %431  ;;  %v429_v5 = vpop.xlane.xlu1 %428 }
 0x13c   :  { %v467_v51 = vsel %vm457_vm10, %v432_v2, %v379_v62  ;;  %v466_v3 = vsel %vm457_vm10, %v429_v5, %v378_v0  ;;  %v426_v7 = vpop.xlane.xlu0 %425 }
 0x13d   :  { %484 = vst.msk [vmem:[%s1307_s2 + $0x38] sm:$0xff] %vm476_vm11, %v467_v51  ;;  %v465_v40 = vsel %vm457_vm10, %v426_v7, %v377_v6 }
 0x13e   :  { %483 = vst.msk [vmem:[%s1307_s2 + $0x30] sm:$0xff] %vm476_vm11, %v466_v3 }
 0x13f   :  { %482 = vst.msk [vmem:[%s1307_s2 + $0x28] sm:$0xff] %vm476_vm11, %v465_v40 }
 0x143   :  { %v441_v27 = vpop.xlane.xlu2 %440  ;;  %v438_v26 = vpop.xlane.xlu1 %437 }
 0x144   :  { %v470_v8 = vsel %vm457_vm10, %v441_v27, %v382_v35  ;;  %v469_v11 = vsel %vm457_vm10, %v438_v26, %v381_v9  ;;  %v435_v17 = vpop.xlane.xlu0 %434 }
 0x145   :  { %487 = vst.msk [vmem:[%s1307_s2 + $0x50] sm:$0xff] %vm476_vm11, %v470_v8  ;;  %v468_v16 = vsel %vm457_vm10, %v435_v17, %v380_v21 }
 0x146   :  { %486 = vst.msk [vmem:[%s1307_s2 + $0x48] sm:$0xff] %vm476_vm11, %v469_v11 }
 0x147   :  { %485 = vst.msk [vmem:[%s1307_s2 + $0x40] sm:$0xff] %vm476_vm11, %v468_v16 }
 0x14b   :  { %v450_v18 = vpop.xlane.xlu2 %449  ;;  %v447_v19 = vpop.xlane.xlu1 %446 }
 0x14c   :  { %v473_v12 = vsel %vm457_vm10, %v450_v18, %v385_v39  ;;  %v472_v54 = vsel %vm457_vm10, %v447_v19, %v384_v44  ;;  %v444_v30 = vpop.xlane.xlu0 %443 }
 0x14d   :  { %490 = vst.msk [vmem:[%s1307_s2 + $0x68] sm:$0xff] %vm476_vm11, %v473_v12  ;;  %v471_v4 = vsel %vm457_vm10, %v444_v30, %v383_v52 }
 0x14e   :  { %489 = vst.msk [vmem:[%s1307_s2 + $0x60] sm:$0xff] %vm476_vm11, %v472_v54 }
 0x14f   :  { %488 = vst.msk [vmem:[%s1307_s2 + $0x58] sm:$0xff] %vm476_vm11, %v471_v4 }
 0x153   :  { %v456_v29 = vpop.xlane.xlu1 %455 }
 0x154   :  { %v475_v34 = vsel %vm457_vm10, %v456_v29, %v387_v23  ;;  %v453_v36 = vpop.xlane.xlu0 %452 }
 0x155   :  { %492 = vst.msk [vmem:[%s1307_s2 + $0x78] sm:$0xff] %vm476_vm11, %v475_v34  ;;  %v474_v37 = vsel %vm457_vm10, %v453_v36, %v386_v38 }
 0x156   :  { %491 = vst.msk [vmem:[%s1307_s2 + $0x70] sm:$0xff] %vm476_vm11, %v474_v37 }

</bundles_post_ra>
